<compile_context>
chip_gen: v7x
topology: tpu7x:2x2x1
jax: 0.10.0
libtpu: 0.0.40
codegen_flags: <defaults>
</compile_context>

<pallas_src>
import functools

import jax
import jax.numpy as jnp
from jax import lax
from jax.experimental import pallas as pl
from jax.experimental.pallas import tpu as pltpu


def _ce_tile_kernel(preds_ref, targets_ref, out_ref, *, num_rows):
    """Masked-CE partial sum for one (tile_rows, C) block of logits."""
    x = preds_ref[...]                      # (T, C) native dtype (bf16 / f32)
    tgt = targets_ref[...]                  # (T, 1) int32; -1 marks invalid rows
    T, C = x.shape

    # Row max and target-logit gather in the NATIVE dtype (compare/select
    # only -> exact; bf16 VALU on v6e/v7x packs 2 elems per vreg position).
    m = jnp.max(x, axis=-1, keepdims=True)                       # (T, 1)
    one_hot = lax.broadcasted_iota(jnp.int32, (T, C), 1) == tgt
    picked = jnp.sum(jnp.where(one_hot, x, jnp.zeros_like(x)),
                     axis=-1, keepdims=True)                     # (T, 1) exact

    # f32 shift / exp / sum-exp (exp runs on the otherwise-free EUP slot).
    xs = x.astype(jnp.float32) - m.astype(jnp.float32)
    sum_exp = jnp.sum(jnp.exp(xs), axis=-1, keepdims=True)       # (T, 1)

    loss = jnp.log(sum_exp) + (m.astype(jnp.float32)
                               - picked.astype(jnp.float32))     # (T, 1)

    # Validity gate: rows past batch_nb_valid carry tgt == -1, and the static
    # row bound covers the out-of-bounds tail of the last partial tile.
    # Select (not multiply) so stale/NaN tail logits cannot leak into the sum.
    row = pl.program_id(0) * T + lax.broadcasted_iota(jnp.int32, (T, 1), 0)
    valid = jnp.logical_and(tgt >= 0, row < num_rows)
    loss = jnp.where(valid, loss, 0.0)

    # Per-tile partial sum splatted into one aligned (8, 128) vreg: a single
    # unmasked lane-dense store instead of T/8 masked vst.msk stores.
    out_ref[...] = jnp.broadcast_to(jnp.sum(loss), (1, 8, 128))


def _vmem_budgets():
    """Return (vmem_limit_bytes, tile_budget_bytes) derived from the chip."""
    try:
        cap = getattr(pltpu.get_tpu_info(), "vmem_capacity_bytes", None)
    except Exception:                       # API drift / not on TPU
        cap = None
    if cap is None:
        cap = 64 * 1024 * 1024              # conservative (v7x-sized) fallback
    if cap >= 96 * 1024 * 1024:             # v5e / v6e class: 128 MiB physical
        return 64 * 1024 * 1024, 48 * 1024 * 1024
    # v7x class: 64 MiB per TensorCore -> leave headroom for compiler scratch.
    return 44 * 1024 * 1024, 28 * 1024 * 1024


def _choose_tile_rows(num_rows, num_classes, in_itemsize, tile_budget_bytes):
    # Resident per row: 2x double-buffered native-dtype logits plus ~3 fused
    # f32 (T, C) elementwise temps (Mosaic keeps ~2-3 alive, not 5), plus the
    # small int32 target column.
    per_row = num_classes * (2 * in_itemsize + 3 * 4) + 4 * 4
    tr = int(tile_budget_bytes // max(per_row, 1))
    if tr >= num_rows:
        return num_rows                     # single full-extent tile (always legal)
    if tr >= 32:
        return (tr // 32) * 32              # multiple of 32: f32/bf16/int8 sublanes
    return max(8, (tr // 8) * 8)            # vocab-scale C: see streaming-LSE TODO


def ce_criterion(preds, targets, batch_nb_valid,
                 weights_valid: float = 1.0, eps: float = 1e-6,
                 tile_rows=None):
    """Pallas implementation of CECriterion.forward.

    preds: (B, N, C) float (any float dtype; DMA'd in its native dtype),
    targets: (B, N) int, batch_nb_valid: (B,) int.
    Returns dict(loss_ce=scalar f32).
    """
    B, N, C = preds.shape
    BN = B * N

    preds2 = preds.reshape(BN, C)                          # native dtype, no pad copy
    # Fold the validity mask into the targets: invalid rows get target -1.
    pos = jnp.arange(N, dtype=jnp.int32)[None, :]
    nvalid = batch_nb_valid.astype(jnp.int32)
    valid = pos < nvalid[:, None]                          # (B, N) bool
    targets2 = jnp.where(valid, targets.astype(jnp.int32), -1).reshape(BN, 1)

    vmem_limit, tile_budget = _vmem_budgets()
    if tile_rows is None:
        tile_rows = _choose_tile_rows(BN, C, jnp.dtype(preds.dtype).itemsize,
                                      tile_budget)
    tr = tile_rows
    grid = pl.cdiv(BN, tr)

    per_tile = pl.pallas_call(
        functools.partial(_ce_tile_kernel, num_rows=BN),
        out_shape=jax.ShapeDtypeStruct((grid, 8, 128), jnp.float32),
        grid=(grid,),
        in_specs=[
            pl.BlockSpec((tr, C), lambda i: (i, 0)),
            pl.BlockSpec((tr, 1), lambda i: (i, 0)),
        ],
        out_specs=pl.BlockSpec((1, 8, 128), lambda i: (i, 0, 0)),
        compiler_params=pltpu.CompilerParams(
            # Independent tiles per step -> the row axis may be megacore-split.
            dimension_semantics=("parallel",),
            vmem_limit_bytes=vmem_limit,
        ),
    )(preds2, targets2)

    # Tiny epilogue in XLA: each tile's partial sum is splatted across its
    # (8, 128) block -- read one copy per tile, sum, scale, divide.
    numer = jnp.float32(weights_valid) * jnp.sum(per_tile[:, 0, 0])
    denom = nvalid.sum().astype(jnp.float32) + jnp.float32(eps)
    return dict(loss_ce=numer / denom)


def _reference(preds, targets, batch_nb_valid, weights_valid=1.0, eps=1e-6):
    # Pure-JAX reference matching the PyTorch CECriterion semantics.
    logp = jax.nn.log_softmax(preds.astype(jnp.float32), axis=-1)
    ce = -jnp.take_along_axis(logp, targets[..., None].astype(jnp.int32),
                              axis=-1)[..., 0]
    B, N = ce.shape
    pos = jnp.arange(N)[None, :]
    mask = (pos < batch_nb_valid[:, None]).astype(jnp.float32) * weights_valid
    return (ce * mask).sum() / (batch_nb_valid.sum().astype(jnp.float32) + eps)


if __name__ == "__main__":
    key = jax.random.PRNGKey(0)
    k1, k2, k3 = jax.random.split(key, 3)

    B, N, C = 2, 8, 32          # batch, max_nb (sequence), num_classes
    preds = jax.random.normal(k1, (B, N, C), dtype=jnp.float32)
    targets = jax.random.randint(k2, (B, N), 0, C, dtype=jnp.int32)
    batch_nb_valid = jax.random.randint(k3, (B,), 1, N + 1, dtype=jnp.int32)

    # f32 path
    out = ce_criterion(preds, targets, batch_nb_valid)
    loss = jax.block_until_ready(out["loss_ce"])
    ref = _reference(preds, targets, batch_nb_valid)
    assert jnp.allclose(loss, ref, rtol=1e-5, atol=1e-5), (loss, ref)

    # bf16 path (native-dtype DMA, f32 shift/exp/log inside the kernel)
    preds_bf16 = preds.astype(jnp.bfloat16)
    out_bf16 = ce_criterion(preds_bf16, targets, batch_nb_valid)
    loss_bf16 = jax.block_until_ready(out_bf16["loss_ce"])
    ref_bf16 = _reference(preds_bf16.astype(jnp.float32), targets, batch_nb_valid)
    assert jnp.allclose(loss_bf16, ref_bf16, rtol=1e-5, atol=1e-5), (loss_bf16, ref_bf16)

    print("KERNEL_OK")
</pallas_src>

<mosaic_0001>
module attributes {stable_mosaic.version = 11 : i64} {
  func.func @_ce_tile_kernel(%arg0: i32, %arg1: memref<16x32xf32, #tpu.memory_space<vmem>>, %arg2: memref<16x1xi32, #tpu.memory_space<vmem>>, %arg3: memref<1x8x128xf32, #tpu.memory_space<vmem>>) attributes {dimension_semantics = [#tpu.dimension_semantics<parallel>], iteration_bounds = array<i64: 1>, scalar_prefetch = 0 : i64, scratch_operands = 0 : i64, tpu.core_type = #tpu.core_type<tc>, window_params = [{transform_indices = @transform_0, window_bounds = array<i64: 16, 32>}, {transform_indices = @transform_1, window_bounds = array<i64: 16, 1>}, {transform_indices = @transform_2, window_bounds = array<i64: 1, 8, 128>}]} {
    %c0 = arith.constant 0 : index
    %c0_0 = arith.constant 0 : index
    %0 = vector.load %arg1[%c0, %c0_0] : memref<16x32xf32, #tpu.memory_space<vmem>>, vector<16x32xf32>
    %c0_1 = arith.constant 0 : index
    %c0_2 = arith.constant 0 : index
    %1 = vector.load %arg2[%c0_1, %c0_2] : memref<16x1xi32, #tpu.memory_space<vmem>>, vector<16x1xi32>
    %cst = arith.constant dense<0xFF800000> : vector<16xf32>
    %2 = vector.multi_reduction <maximumf>, %0, %cst [1] : vector<16x32xf32> to vector<16xf32>
    %3 = vector.shape_cast %2 : vector<16xf32> to vector<16x1xf32>
    %4 = tpu.iota {dimensions = array<i32: 1>} : vector<16x32xi32>
    %5 = vector.broadcast %1 : vector<16x1xi32> to vector<16x32xi32>
    %6 = arith.cmpi eq, %4, %5 : vector<16x32xi32>
    %cst_3 = arith.constant 0.000000e+00 : f32
    %7 = vector.broadcast %cst_3 : f32 to vector<16x32xf32>
    %8 = arith.select %6, %0, %7 : vector<16x32xi1>, vector<16x32xf32>
    %cst_4 = arith.constant dense<0.000000e+00> : vector<16xf32>
    %9 = vector.multi_reduction <add>, %8, %cst_4 [1] : vector<16x32xf32> to vector<16xf32>
    %10 = vector.shape_cast %9 : vector<16xf32> to vector<16x1xf32>
    %11 = vector.broadcast %3 : vector<16x1xf32> to vector<16x32xf32>
    %12 = arith.subf %0, %11 : vector<16x32xf32>
    %13 = math.exp %12 : vector<16x32xf32>
    %cst_5 = arith.constant dense<0.000000e+00> : vector<16xf32>
    %14 = vector.multi_reduction <add>, %13, %cst_5 [1] : vector<16x32xf32> to vector<16xf32>
    %15 = vector.shape_cast %14 : vector<16xf32> to vector<16x1xf32>
    %16 = math.log %15 : vector<16x1xf32>
    %17 = arith.subf %3, %10 : vector<16x1xf32>
    %18 = arith.addf %16, %17 : vector<16x1xf32>
    %c16_i32 = arith.constant 16 : i32
    %19 = arith.muli %arg0, %c16_i32 : i32
    %20 = tpu.iota {dimensions = array<i32: 0>} : vector<16x1xi32>
    %21 = vector.broadcast %19 : i32 to vector<16x1xi32>
    %22 = arith.addi %21, %20 : vector<16x1xi32>
    %c0_i32 = arith.constant 0 : i32
    %23 = vector.broadcast %c0_i32 : i32 to vector<16x1xi32>
    %24 = arith.cmpi sge, %1, %23 : vector<16x1xi32>
    %c16_i32_6 = arith.constant 16 : i32
    %25 = vector.broadcast %c16_i32_6 : i32 to vector<16x1xi32>
    %26 = arith.cmpi slt, %22, %25 : vector<16x1xi32>
    %27 = arith.andi %24, %26 : vector<16x1xi1>
    %cst_7 = arith.constant 0.000000e+00 : f32
    %28 = vector.broadcast %cst_7 : f32 to vector<16x1xf32>
    %29 = arith.select %27, %18, %28 : vector<16x1xi1>, vector<16x1xf32>
    %30 = vector.shape_cast %29 : vector<16x1xf32> to vector<1x16x1xf32>
    %cst_8 = arith.constant dense<0.000000e+00> : vector<1xf32>
    %31 = vector.multi_reduction <add>, %30, %cst_8 [1, 2] : vector<1x16x1xf32> to vector<1xf32>
    %32 = vector.shape_cast %31 : vector<1xf32> to vector<1x1x1xf32>
    %33 = vector.extract %32[0, 0, 0] : f32 from vector<1x1x1xf32>
    %34 = vector.broadcast %33 : f32 to vector<1x8x128xf32>
    %c0_9 = arith.constant 0 : index
    %c0_10 = arith.constant 0 : index
    %c0_11 = arith.constant 0 : index
    %35 = vector.load %arg3[%c0_9, %c0_10, %c0_11] : memref<1x8x128xf32, #tpu.memory_space<vmem>>, vector<1x8x128xf32>
    tpu.vector_store %arg3[%c0_9, %c0_10, %c0_11], %34 {strides = array<i32>} : memref<1x8x128xf32, #tpu.memory_space<vmem>>, vector<1x8x128xf32>,
    return
  }
  func.func @transform_0(%arg0: i32) -> (i32, i32) {
    %c0_i32 = arith.constant 0 : i32
    %c0_i32_0 = arith.constant 0 : i32
    return %arg0, %c0_i32 : i32, i32
  }
  func.func @transform_1(%arg0: i32) -> (i32, i32) {
    %c0_i32 = arith.constant 0 : i32
    %c0_i32_0 = arith.constant 0 : i32
    return %arg0, %c0_i32 : i32, i32
  }
  func.func @transform_2(%arg0: i32) -> (i32, i32, i32) {
    %c0_i32 = arith.constant 0 : i32
    %c0_i32_0 = arith.constant 0 : i32
    %c0_i32_1 = arith.constant 0 : i32
    return %arg0, %c0_i32, %c0_i32_0 : i32, i32, i32
  }
}

</mosaic_0001>

<bundles_post_ra>
// kernel: tpu_custom_call.1
= control target key start
LH: loop header
LB: loop body
LE: loop exit
PB: predicated region body
PF: predicated region fallthrough
CT: control target
= control target key end

     0   :  { %vm16_vm0 = vcmask 261120   ;;  %v143_v4 = vmov 0   ;;  %s190_s0 = inlined_call_operand.vmem [shape: f32[16,32], index: 0, kind: input, shape index: {}]   ;;  %s191_s1 = inlined_call_operand.vmem [shape: s32[16,1], index: 1, kind: input, shape index: {}]   ;;  %s192_s2 = inlined_call_operand.hbm [shape: f32[1,8,128], index: 2, kind: output, shape index: {}]  }
   0x1   :  { %v12_v0 = vld [vmem:[%s190_s0] sm:$0xff]  ;;  %v13_v1 = vld [vmem:[%s190_s0 + $0x8] sm:$0xff]  ;;  %109 = vset.pattern.permute.xlu1 %v143_v4  ;;  %110 = vset.pattern.permute.xlu0 %v143_v4 }
   0x2   :  { %v14_v2 = vld [vmem:[%s191_s1] sm:$0xff]  ;;  %v17_v3 = vsel %vm16_vm0, %v12_v0, -inf }
   0x3   :  { %7 = vsyncpa [#allocation3], 0  ;;  %18 = vmax.xlane.f32.xlu0 %v17_v3  ;;  %26 = vperm.xlu1 %109, %v14_v2   ;;  %v20_v5 = vsel %vm16_vm0, %v13_v1, -inf  ;;  %v15_v6 = vld [vmem:[%s191_s1 + $0x8] sm:$0xff]  ;;  %v23_v11 = vlaneseq  ;;  %vm68_vm3 = vcmp.ge.s32.totalorder %v14_v2, 0  ;;  %vm76_vm5 = vcmask 7168  }
   0x4   :  { %vm69_vm4 = vcmp.ge.s32.totalorder %v15_v6, 0  ;;  %s144_s0 = smov [#allocation2]  }
   0x5   :  { %v24_v15 = vand.u32 127, %v23_v11  ;;  %s97_s1 = sshll.u32 %s144_s0, 4  ;;  %s98_s1 = int_to_ptr.vmem [resolvable:$true] %s97_s1 }
   0x6   :  { %s119_s18 = scalar_lea.vmem %s98_s1, 128  ;;  %p124_p1 = scmp.lt.s32.totalorder %s98_s1, %s98_s1 }
   0x7   :  { %21 = vmax.xlane.f32.xlu0 %v20_v5  ;;  %29 = vperm.xlu1 %109, %v15_v6   ;;  %p120_p0 = scmp.ne.s32.totalorder %s98_s1, %s119_s18  ;;  %p125_p2 = scmp.lt.s32.totalorder %s119_s18, %s119_s18 }
   0x9   :  { %p126_p3 = por %p125_p2, %p124_p1 }
   0xb   :  { %p127_p4 = pnand %p126_p3, %p120_p0 }
  0x82   :  { %v27_v14 = vpop.permute.xlu1 %26 }
  0x83   :  { %vm31_vm1 = vcmp.eq.s32.totalorder %v24_v15, %v27_v14 }
  0x84   :  { %v33_v18 = vsel %vm31_vm1, %v12_v0, 0.0 }
  0x85   :  { %v35_v20 = vsel %vm16_vm0, %v33_v18, 0.0 }
  0x86   :  { %v30_v16 = vpop.permute.xlu1 %29 }
  0x87   :  { %vm32_vm2 = vcmp.eq.s32.totalorder %v24_v15, %v30_v16 }
  0x88   :  { %v34_v22 = vsel %vm32_vm2, %v13_v1, 0.0 }
  0x89   :  { %v38_v24 = vsel %vm16_vm0, %v34_v22, 0.0 }
  0x90   :  { %v19_v7 = vpop.xlane.xlu0 %18 }
  0x91   :  { %v41_v8 = vsub.f32 %v12_v0, %v19_v7 }
  0x93   :  { %v43_v9 = vmul.f32 1.442695, %v41_v8 }
  0x94   :  { %v22_v10 = vpop.xlane.xlu0 %21 }
  0x95   :  { %111 = vpow2.f32 %v43_v9  ;;  %v42_v12 = vsub.f32 %v13_v1, %v22_v10 }
  0x97   :  { %v45_v13 = vmul.f32 1.442695, %v42_v12 }
  0x99   :  { %113 = vpow2.f32 %v45_v13 }
  0x9f   :  { %v112_v17 = vpop.eup %111 }
  0xa0   :  { %v47_v19 = vsel %vm16_vm0, %v112_v17, 0.0 }
  0xa1   :  { %48 = vadd.xlane.f32.xlu0 %v47_v19 }
  0xa3   :  { %v114_v21 = vpop.eup %113 }
  0xa4   :  { %v50_v23 = vsel %vm16_vm0, %v114_v21, 0.0 }
  0xa5   :  { %36 = vadd.xlane.f32.xlu0 %v35_v20  ;;  %51 = vadd.xlane.f32.xlu1 %v50_v23 }
  0xa9   :  { %39 = vadd.xlane.f32.xlu0 %v38_v24 }
 0x12e   :  { %v49_v25 = vpop.xlane.xlu0 %48 }
 0x12f   :  { %115 = vlog2.f32 %v49_v25 }
 0x132   :  { %v52_v26 = vpop.xlane.xlu1 %51  ;;  %v37_v27 = vpop.xlane.xlu0 %36 }
 0x133   :  { %117 = vlog2.f32 %v52_v26  ;;  %v57_v30 = vsub.f32 %v19_v7, %v37_v27 }
 0x136   :  { %v40_v31 = vpop.xlane.xlu0 %39 }
 0x137   :  { %v58_v35 = vsub.f32 %v22_v10, %v40_v31 }
 0x139   :  { %v116_v28 = vpop.eup %115 }
 0x13a   :  { %v54_v29 = vmul.f32 0.6931472, %v116_v28 }
 0x13c   :  { %v59_v32 = vadd.f32 %v57_v30, %v54_v29 }
 0x13d   :  { %v118_v33 = vpop.eup %117 }
 0x13e   :  { %v56_v34 = vmul.f32 0.6931472, %v118_v33  ;;  %v74_v37 = vsel %vm68_vm3, %v59_v32, 0.0 }
 0x13f   :  { %v77_v39 = vsel %vm76_vm5, %v74_v37, 0.0 }
 0x140   :  { %v60_v36 = vadd.f32 %v58_v35, %v56_v34 }
 0x142   :  { %v75_v38 = vsel %vm69_vm4, %v60_v36, 0.0 }
 0x143   :  { %v78_v40 = vsel %vm76_vm5, %v75_v38, 0.0 }
 0x144   :  { %v79_v41 = vadd.f32 %v78_v40, %v77_v39 }
 0x146   :  { %80 = vadd.xlane.f32.xlu0 %v79_v41 }
 0x1d3   :  { %v81_v42 = vpop.xlane.xlu0 %80 }
 0x1d4   :  { %v82_v43 = vrot.slane %v81_v42, 4 }
 0x1d6   :  { %v83_v44 = vadd.f32 %v82_v43, %v81_v42 }
 0x1d8   :  { %v84_v45 = vrot.slane %v83_v44, 2 }
 0x1da   :  { %v85_v46 = vadd.f32 %v84_v45, %v83_v44 }
 0x1dc   :  { %v86_v47 = vrot.slane %v85_v46, 1 }
 0x1de   :  { %v87_v48 = vadd.f32 %v86_v47, %v85_v46 }
 0x1e0   :  { %105 = vpush %v87_v48 }
 0x211   :  { %s106_s17 = spop %105 }
 0x212   :  { %v89_v49 = vstv %s106_s17 }
 0x213   :  { %90 = vst [vmem:[#allocation2] sm:$0xff] %v89_v49 }
 0x214   :  { %130 = shalt.err (!%p127_p4)
}
 0x215   :  { %s131_s21 = scalar_lea.hbm %s192_s2, 128 }
 0x216   :  { %p132_p5 = scmp.ne.s32.totalorder %s192_s2, %s131_s21  ;;  %p135_p6 = scmp.lt.u32.totalorder %s131_s21, %s192_s2 }
 0x218   :  { %p137_p7 = pnand %p135_p6, %p132_p5 }
 0x21a   :  { %140 = shalt.err (!%p137_p7)
}
 0x21b   :  { %100 = dma.vmem_to_hbm [thread:$0]  %s98_s1, 128, %s192_s2, [#allocation3]  }
 0x21c   :  { %141 = dma.done.wait [#allocation3], 128  }
 0x21d   :  { %142 = vsyncadd [#allocation3], 4294967168 }
 0x21e   :  { %104 = vsyncpa [#allocation3], 1 }

</bundles_post_ra>
